<compile_context>
chip_gen: v6e
topology: v6e:2x2x1
jax: 0.10.0
libtpu: 0.0.40
codegen_flags: <defaults>
</compile_context>

<pallas_src>
import functools

import numpy as np
import jax
import jax.numpy as jnp
from jax.experimental import pallas as pl
from jax.experimental.pallas import tpu as pltpu


LANE = 128      # lane width; hidden dim padded to this for lane-dense intermediates
SUBLANE = 8     # sublane width; output/action dim padded to this only


def _round_up(x, m):
    return ((x + m - 1) // m) * m


# ----------------------------------------------------------------------------
# Kernel
# ----------------------------------------------------------------------------
def critic_kernel(x_ref, w1_ref, b1_ref, w2_ref, b2_ref, w3_ref, b3_ref, out_ref):
    """One batch tile: fc3(relu(fc2(relu(fc1(x))))).

    x arrives as f32 and is cast to bf16 in-kernel (VPU op, hidden under DMA).
    Weights are bf16 (zero-padded); biases are f32.  All matmuls accumulate in
    f32 on the MXU.
    """
    x = x_ref[...].astype(jnp.bfloat16)

    h1 = jnp.dot(x, w1_ref[...], preferred_element_type=jnp.float32)
    h1 = jnp.maximum(h1 + b1_ref[...], 0.0)

    h2 = jnp.dot(h1.astype(jnp.bfloat16), w2_ref[...],
                 preferred_element_type=jnp.float32)
    h2 = jnp.maximum(h2 + b2_ref[...], 0.0)

    q = jnp.dot(h2.astype(jnp.bfloat16), w3_ref[...],
                preferred_element_type=jnp.float32) + b3_ref[...]
    out_ref[...] = q.astype(out_ref.dtype)


# ----------------------------------------------------------------------------
# Parameter preparation (padding + dtype) and wrapper
# ----------------------------------------------------------------------------
def prepare_critic_params(params):
    """Pad hidden dim to 128, action dim to 8; cast weights to bf16.

    Zero padding is mathematically exact for this MLP: padded hidden units get
    bias 0 -> relu 0 -> contribute nothing downstream; padded output columns
    are exactly 0 and are sliced off in the wrapper.
    """
    w1, b1, w2, b2, w3, b3 = params
    s, h = w1.shape
    a = w3.shape[1]
    hp = _round_up(h, LANE)
    ap = _round_up(a, SUBLANE)   # narrow output: dominant HBM traffic was the write

    def pad2(x, r, c):
        return jnp.pad(x, ((0, r - x.shape[0]), (0, c - x.shape[1])))

    w1p = pad2(w1, s, hp).astype(jnp.bfloat16)
    w2p = pad2(w2, hp, hp).astype(jnp.bfloat16)
    w3p = pad2(w3, hp, ap).astype(jnp.bfloat16)
    b1p = pad2(b1.reshape(1, -1), 1, hp).astype(jnp.float32)
    b2p = pad2(b2.reshape(1, -1), 1, hp).astype(jnp.float32)
    b3p = pad2(b3.reshape(1, -1), 1, ap).astype(jnp.float32)
    return (w1p, b1p, w2p, b2p, w3p, b3p)


@functools.partial(jax.jit, static_argnames=("action_size", "block_b"))
def critic_forward(state, prepared, action_size, block_b=4096):
    """state: (B, state_size) f32.  prepared: output of prepare_critic_params."""
    w1, b1, w2, b2, w3, b3 = prepared
    batch, s = state.shape
    hp = w1.shape[1]
    ap = w3.shape[1]

    # Batch tile: multiple of 8 (sublane).  Keep >= 2 grid steps whenever the
    # batch allows so the "parallel" axis can shard across v7x's two
    # TensorCores; cap at block_b.  No explicit batch padding: grid uses cdiv
    # and the partial last block's out-of-bounds rows are simply never stored.
    if batch <= SUBLANE:
        tb = SUBLANE
    else:
        tb = min(block_b, _round_up(pl.cdiv(batch, 2), SUBLANE))
    grid_b = pl.cdiv(batch, tb)

    const = lambda i: (0, 0)                # weights: same block every grid step

    flops = 2 * batch * (s * hp + hp * hp + hp * ap)
    bytes_accessed = (batch * s * 4                       # f32 state stream (read)
                      + batch * ap * 4                    # f32 output (write, 8 wide)
                      + (s * hp + hp * hp + hp * ap) * 2  # bf16 weights (once)
                      + (2 * hp + ap) * 4)                # f32 biases (once)

    out = pl.pallas_call(
        critic_kernel,
        out_shape=jax.ShapeDtypeStruct((batch, ap), jnp.float32),
        grid_spec=pltpu.PrefetchScalarGridSpec(
            num_scalar_prefetch=0,
            grid=(grid_b,),
            in_specs=[
                pl.BlockSpec((tb, s), lambda i: (i, 0)),   # streamed f32 state tile
                pl.BlockSpec((s, hp), const),              # fc1 weight (resident)
                pl.BlockSpec((1, hp), const),              # fc1 bias
                pl.BlockSpec((hp, hp), const),             # fc2 weight
                pl.BlockSpec((1, hp), const),              # fc2 bias
                pl.BlockSpec((hp, ap), const),             # fc3 weight (8 wide)
                pl.BlockSpec((1, ap), const),              # fc3 bias
            ],
            out_specs=pl.BlockSpec((tb, ap), lambda i: (i, 0)),  # narrow output
        ),
        compiler_params=pltpu.CompilerParams(
            dimension_semantics=("parallel",)),            # shard batch across TCs (v7x)
        cost_estimate=pl.CostEstimate(
            flops=flops, transcendentals=0, bytes_accessed=bytes_accessed),
    )(state, w1, b1, w2, b2, w3, b3)

    return out[:, :action_size]


# ----------------------------------------------------------------------------
# Parameter init mimicking Critic.reset_parameters()
# ----------------------------------------------------------------------------
def init_critic_params(state_size, action_size, hidden_size=32, seed=0):
    """Deterministic init mimicking the PyTorch Critic.

    Note: PyTorch's hidden_init uses weight.size()[0] == out_features, so
    lim = 1/sqrt(out_features) for fc1/fc2; fc3 weights ~ U(-3e-3, 3e-3).
    Biases keep nn.Linear's default U(-1/sqrt(fan_in), 1/sqrt(fan_in)).
    """
    key = jax.random.PRNGKey(seed)
    k = jax.random.split(key, 6)

    lim1 = 1.0 / np.sqrt(hidden_size)
    lim2 = 1.0 / np.sqrt(hidden_size)
    lim3 = 3e-3

    # weights stored as (in, out)
    w1 = jax.random.uniform(k[0], (state_size, hidden_size), jnp.float32, -lim1, lim1)
    w2 = jax.random.uniform(k[1], (hidden_size, hidden_size), jnp.float32, -lim2, lim2)
    w3 = jax.random.uniform(k[2], (hidden_size, action_size), jnp.float32, -lim3, lim3)

    bl1 = 1.0 / np.sqrt(state_size)
    bl2 = 1.0 / np.sqrt(hidden_size)
    bl3 = 1.0 / np.sqrt(hidden_size)
    b1 = jax.random.uniform(k[3], (1, hidden_size), jnp.float32, -bl1, bl1)
    b2 = jax.random.uniform(k[4], (1, hidden_size), jnp.float32, -bl2, bl2)
    b3 = jax.random.uniform(k[5], (1, action_size), jnp.float32, -bl3, bl3)

    return (w1, b1, w2, b2, w3, b3)


# ----------------------------------------------------------------------------
# References
# ----------------------------------------------------------------------------
def critic_reference_f32(state, params):
    """Pure-f32 JAX reference matching the PyTorch module's math."""
    w1, b1, w2, b2, w3, b3 = params
    h1 = jnp.maximum(state @ w1 + b1, 0.0)
    h2 = jnp.maximum(h1 @ w2 + b2, 0.0)
    return h2 @ w3 + b3


def critic_reference_bf16(state, params):
    """Reference emulating the kernel's bf16-input / f32-accumulate numerics."""
    w1, b1, w2, b2, w3, b3 = params
    bf, f32 = jnp.bfloat16, jnp.float32
    x = state.astype(bf)
    h1 = jnp.maximum(jnp.dot(x, w1.astype(bf), preferred_element_type=f32) + b1, 0.0)
    h2 = jnp.maximum(jnp.dot(h1.astype(bf), w2.astype(bf),
                             preferred_element_type=f32) + b2, 0.0)
    return jnp.dot(h2.astype(bf), w3.astype(bf), preferred_element_type=f32) + b3


if __name__ == "__main__":
    state_size = 16
    action_size = 4
    hidden_size = 32

    params = init_critic_params(state_size, action_size, hidden_size, seed=1)
    prepared = prepare_critic_params(params)

    key = jax.random.PRNGKey(0)

    # Small primary check (single grid step).
    state = jax.random.normal(key, (8, state_size), jnp.float32)
    q = jax.block_until_ready(critic_forward(state, prepared, action_size))

    q_bf16 = critic_reference_bf16(state, params)
    np.testing.assert_allclose(np.asarray(q), np.asarray(q_bf16), rtol=1e-4, atol=1e-5)
    q_f32 = critic_reference_f32(state, params)
    np.testing.assert_allclose(np.asarray(q), np.asarray(q_f32), rtol=2e-2, atol=2e-3)

    # Second check exercising the multi-step grid and partial last block
    # (batch not a multiple of the tile; no wrapper-side padding).
    state2 = jax.random.normal(jax.random.PRNGKey(2), (100, state_size), jnp.float32)
    q2 = jax.block_until_ready(critic_forward(state2, prepared, action_size))
    q2_bf16 = critic_reference_bf16(state2, params)
    np.testing.assert_allclose(np.asarray(q2), np.asarray(q2_bf16), rtol=1e-4, atol=1e-5)

    print("KERNEL_OK")
</pallas_src>

<mosaic_0001>
module attributes {stable_mosaic.version = 11 : i64} {
  func.func @critic_kernel(%arg0: i32, %arg1: memref<8x16xf32, #tpu.memory_space<vmem>>, %arg2: memref<16x128xbf16, #tpu.memory_space<vmem>>, %arg3: memref<1x128xf32, #tpu.memory_space<vmem>>, %arg4: memref<128x128xbf16, #tpu.memory_space<vmem>>, %arg5: memref<1x128xf32, #tpu.memory_space<vmem>>, %arg6: memref<128x8xbf16, #tpu.memory_space<vmem>>, %arg7: memref<1x8xf32, #tpu.memory_space<vmem>>, %arg8: memref<8x8xf32, #tpu.memory_space<vmem>>) attributes {dimension_semantics = [#tpu.dimension_semantics<parallel>], iteration_bounds = array<i64: 1>, scalar_prefetch = 0 : i64, scratch_operands = 0 : i64, tpu.core_type = #tpu.core_type<tc>, window_params = [{transform_indices = @transform_0, window_bounds = array<i64: 8, 16>}, {pipeline_mode = #tpu.pipeline_mode<synchronous>, transform_indices = @transform_1, window_bounds = array<i64: 16, 128>}, {pipeline_mode = #tpu.pipeline_mode<synchronous>, transform_indices = @transform_2, window_bounds = array<i64: 1, 128>}, {pipeline_mode = #tpu.pipeline_mode<synchronous>, transform_indices = @transform_3, window_bounds = array<i64: 128, 128>}, {pipeline_mode = #tpu.pipeline_mode<synchronous>, transform_indices = @transform_4, window_bounds = array<i64: 1, 128>}, {pipeline_mode = #tpu.pipeline_mode<synchronous>, transform_indices = @transform_5, window_bounds = array<i64: 128, 8>}, {pipeline_mode = #tpu.pipeline_mode<synchronous>, transform_indices = @transform_6, window_bounds = array<i64: 1, 8>}, {transform_indices = @transform_7, window_bounds = array<i64: 8, 8>}]} {
    %c0 = arith.constant 0 : index
    %c0_0 = arith.constant 0 : index
    %0 = vector.load %arg1[%c0, %c0_0] : memref<8x16xf32, #tpu.memory_space<vmem>>, vector<8x16xf32>
    %1 = arith.truncf %0 : vector<8x16xf32> to vector<8x16xbf16>
    %c0_1 = arith.constant 0 : index
    %c0_2 = arith.constant 0 : index
    %2 = vector.load %arg2[%c0_1, %c0_2] : memref<16x128xbf16, #tpu.memory_space<vmem>>, vector<16x128xbf16>
    %cst = arith.constant dense<0.000000e+00> : vector<8x128xf32>
    %3 = tpu.matmul %1, %2, %cst {dimension_numbers = #tpu.dot_dimension_numbers<[1], [0], [0], [1], [0, 0, 1, 1], [], []>} : vector<8x16xbf16>, vector<16x128xbf16>, vector<8x128xf32> -> vector<8x128xf32>
    %c0_3 = arith.constant 0 : index
    %c0_4 = arith.constant 0 : index
    %4 = vector.load %arg3[%c0_3, %c0_4] : memref<1x128xf32, #tpu.memory_space<vmem>>, vector<1x128xf32>
    %5 = vector.broadcast %4 : vector<1x128xf32> to vector<8x128xf32>
    %6 = arith.addf %3, %5 : vector<8x128xf32>
    %cst_5 = arith.constant 0.000000e+00 : f32
    %7 = vector.broadcast %cst_5 : f32 to vector<8x128xf32>
    %8 = arith.maximumf %6, %7 : vector<8x128xf32>
    %9 = arith.truncf %8 : vector<8x128xf32> to vector<8x128xbf16>
    %c0_6 = arith.constant 0 : index
    %c0_7 = arith.constant 0 : index
    %10 = vector.load %arg4[%c0_6, %c0_7] : memref<128x128xbf16, #tpu.memory_space<vmem>>, vector<128x128xbf16>
    %cst_8 = arith.constant dense<0.000000e+00> : vector<8x128xf32>
    %11 = tpu.matmul %9, %10, %cst_8 {dimension_numbers = #tpu.dot_dimension_numbers<[1], [0], [0], [1], [0, 0, 1, 1], [], []>} : vector<8x128xbf16>, vector<128x128xbf16>, vector<8x128xf32> -> vector<8x128xf32>
    %c0_9 = arith.constant 0 : index
    %c0_10 = arith.constant 0 : index
    %12 = vector.load %arg5[%c0_9, %c0_10] : memref<1x128xf32, #tpu.memory_space<vmem>>, vector<1x128xf32>
    %13 = vector.broadcast %12 : vector<1x128xf32> to vector<8x128xf32>
    %14 = arith.addf %11, %13 : vector<8x128xf32>
    %cst_11 = arith.constant 0.000000e+00 : f32
    %15 = vector.broadcast %cst_11 : f32 to vector<8x128xf32>
    %16 = arith.maximumf %14, %15 : vector<8x128xf32>
    %17 = arith.truncf %16 : vector<8x128xf32> to vector<8x128xbf16>
    %c0_12 = arith.constant 0 : index
    %c0_13 = arith.constant 0 : index
    %18 = vector.load %arg6[%c0_12, %c0_13] : memref<128x8xbf16, #tpu.memory_space<vmem>>, vector<128x8xbf16>
    %cst_14 = arith.constant dense<0.000000e+00> : vector<8x8xf32>
    %19 = tpu.matmul %17, %18, %cst_14 {dimension_numbers = #tpu.dot_dimension_numbers<[1], [0], [0], [1], [0, 0, 1, 1], [], []>} : vector<8x128xbf16>, vector<128x8xbf16>, vector<8x8xf32> -> vector<8x8xf32>
    %c0_15 = arith.constant 0 : index
    %c0_16 = arith.constant 0 : index
    %20 = vector.load %arg7[%c0_15, %c0_16] : memref<1x8xf32, #tpu.memory_space<vmem>>, vector<1x8xf32>
    %21 = vector.broadcast %20 : vector<1x8xf32> to vector<8x8xf32>
    %22 = arith.addf %19, %21 : vector<8x8xf32>
    %c0_17 = arith.constant 0 : index
    %c0_18 = arith.constant 0 : index
    %23 = vector.load %arg8[%c0_17, %c0_18] : memref<8x8xf32, #tpu.memory_space<vmem>>, vector<8x8xf32>
    tpu.vector_store %arg8[%c0_17, %c0_18], %22 {strides = array<i32>} : memref<8x8xf32, #tpu.memory_space<vmem>>, vector<8x8xf32>,
    return
  }
  func.func @transform_0(%arg0: i32) -> (i32, i32) {
    %c0_i32 = arith.constant 0 : i32
    %c0_i32_0 = arith.constant 0 : i32
    return %arg0, %c0_i32 : i32, i32
  }
  func.func @transform_1(%arg0: i32) -> (i32, i32) {
    %c0_i32 = arith.constant 0 : i32
    %c0_i32_0 = arith.constant 0 : i32
    %c0_i32_1 = arith.constant 0 : i32
    return %c0_i32, %c0_i32_0 : i32, i32
  }
  func.func @transform_2(%arg0: i32) -> (i32, i32) {
    %c0_i32 = arith.constant 0 : i32
    %c0_i32_0 = arith.constant 0 : i32
    %c0_i32_1 = arith.constant 0 : i32
    return %c0_i32, %c0_i32_0 : i32, i32
  }
  func.func @transform_3(%arg0: i32) -> (i32, i32) {
    %c0_i32 = arith.constant 0 : i32
    %c0_i32_0 = arith.constant 0 : i32
    %c0_i32_1 = arith.constant 0 : i32
    return %c0_i32, %c0_i32_0 : i32, i32
  }
  func.func @transform_4(%arg0: i32) -> (i32, i32) {
    %c0_i32 = arith.constant 0 : i32
    %c0_i32_0 = arith.constant 0 : i32
    %c0_i32_1 = arith.constant 0 : i32
    return %c0_i32, %c0_i32_0 : i32, i32
  }
  func.func @transform_5(%arg0: i32) -> (i32, i32) {
    %c0_i32 = arith.constant 0 : i32
    %c0_i32_0 = arith.constant 0 : i32
    %c0_i32_1 = arith.constant 0 : i32
    return %c0_i32, %c0_i32_0 : i32, i32
  }
  func.func @transform_6(%arg0: i32) -> (i32, i32) {
    %c0_i32 = arith.constant 0 : i32
    %c0_i32_0 = arith.constant 0 : i32
    %c0_i32_1 = arith.constant 0 : i32
    return %c0_i32, %c0_i32_0 : i32, i32
  }
  func.func @transform_7(%arg0: i32) -> (i32, i32) {
    %c0_i32 = arith.constant 0 : i32
    %c0_i32_0 = arith.constant 0 : i32
    return %arg0, %c0_i32 : i32, i32
  }
}

</mosaic_0001>

<bundles_post_ra>
// kernel: critic_forward.1
= control target key start
LH: loop header
LB: loop body
LE: loop exit
PB: predicated region body
PF: predicated region fallthrough
CT: control target
= control target key end

     0   :  { %12 = vsyncpa [#allocation3], 0  ;;  %s634_s0 = inlined_call_operand.vmem [shape: f32[8,16], index: 0, kind: input, shape index: {}]   ;;  %s635_s1 = inlined_call_operand.hbm [shape: bf16[16,128], index: 1, kind: input, shape index: {}]   ;;  %s636_s2 = inlined_call_operand.vmem [shape: f32[1,128], index: 2, kind: input, shape index: {}]   ;;  %s637_s3 = inlined_call_operand.vmem [shape: bf16[128,128], index: 3, kind: input, shape index: {}]   ;;  %s638_s4 = inlined_call_operand.hbm [shape: f32[1,128], index: 4, kind: input, shape index: {}]   ;;  %s639_s5 = inlined_call_operand.vmem [shape: bf16[128,8], index: 5, kind: input, shape index: {}]   ;;  %s640_s6 = inlined_call_operand.vmem [shape: f32[1,8], index: 6, kind: input, shape index: {}]   ;;  %s641_s7 = inlined_call_operand.vmem [shape: f32[8,8], index: 7, kind: output, shape index: {}]  }
   0x1   :  { %13 = vsyncpa [#allocation5], 0  ;;  %s502_s24 = smov [#allocation2]  }
   0x2   :  { %s21_s25 = sshll.u32 %s502_s24, 4  ;;  %s22_s25 = int_to_ptr.vmem [resolvable:$true] %s21_s25 }
   0x3   :  { %s466_s26 = scalar_lea.vmem %s22_s25, 128  ;;  %p471_p1 = scmp.lt.s32.totalorder %s22_s25, %s22_s25 }
   0x4   :  { %p467_p0 = scmp.ne.s32.totalorder %s22_s25, %s466_s26  ;;  %p472_p2 = scmp.lt.s32.totalorder %s466_s26, %s466_s26 }
   0x6   :  { %p473_p3 = por %p472_p2, %p471_p1 }
   0x8   :  { %p474_p4 = pnand %p473_p3, %p467_p0 }
   0xa   :  { %477 = shalt.err (!%p474_p4)
}
   0xb   :  { %s503_s27 = smov 64   ;;  %s504_s28 = smov 4  }
   0xc   :  { %27 = dma.hbm_to_vmem [thread:$0]  %s635_s1, 128, %s22_s25, [#allocation3], %s503_s27, %s503_s27, %s504_s28  }
   0xd   :  { %s505_s8 = smov [#allocation4]  }
   0xe   :  { %s38_s9 = sshll.u32 %s505_s8, 4  ;;  %s39_s9 = int_to_ptr.vmem [resolvable:$true] %s38_s9 }
   0xf   :  { %s486_s10 = scalar_lea.vmem %s39_s9, 16  ;;  %s490_s11 = scalar_lea.vmem %s39_s9, 32 }
  0x10   :  { %p487_p5 = scmp.ne.s32.totalorder %s39_s9, %s486_s10  ;;  %p491_p6 = scmp.lt.s32.totalorder %s39_s9, %s39_s9 }
  0x11   :  { %p492_p7 = scmp.lt.s32.totalorder %s490_s11, %s486_s10 }
  0x13   :  { %p493_p8 = por %p492_p7, %p491_p6 }
  0x15   :  { %p494_p9 = pnand %p493_p8, %p487_p5 }
  0x17   :  { %497 = shalt.err (!%p494_p9)
}
  0x18   :  { %41 = dma.hbm_to_vmem [thread:$0]  %s638_s4, 16, %s39_s9, [#allocation5]  }
  0x19   :  { %498 = dma.done.wait [#allocation3], 128  }
  0x1a   :  { %499 = vsyncadd [#allocation3], 4294967168 }
  0x1b   :  { %500 = dma.done.wait [#allocation5], 16  }
  0x1c   :  { %501 = vsyncadd [#allocation5], 4294967280  ;;  %v506_v0 = vmov 0.0   ;;  %vm507_vm0 = vmmov 0   ;;  %v441_v1 = vld [vmem:[#allocation2] sm:$0xff]   ;;  %vm70_vm1 = vcmask 130048  }
  0x1d   :  { %389 = vmatprep.subr.bf16.mxu0 %v506_v0  ;;  %391 = vmatprep.mubr.msk.bf16.mxu0 %vm507_vm0, %v506_v0  ;;  %v53_v2 = vld [vmem:[%s634_s0] sm:$0xff]  ;;  %v442_v4 = vld [vmem:[%s637_s3 + $0x38] sm:$0xff]   ;;  %v443_v5 = vld [vmem:[%s637_s3 + $0x30] sm:$0xff]   ;;  %vm340_vm2 = vcmask 64512  }
  0x1e   :  { %395 = vmatprep.subr.bf16.mxu1 %v506_v0  ;;  %411 = vmatprep.mubr.msk.bf16.mxu1 %vm507_vm0, %v506_v0  ;;  %v54_v3 = vpack.c.bf16 %v53_v2, %v53_v2  ;;  %v444_v6 = vld [vmem:[%s637_s3 + $0x28] sm:$0xff]   ;;  %v445_v7 = vld [vmem:[%s637_s3 + $0x20] sm:$0xff]   ;;  %v446_v8 = vld [vmem:[%s637_s3 + $0x18] sm:$0xff]  }
  0x1f   :  { %390 = vmatpush3.bf16.msra.mxu0 %v441_v1  ;;  %396 = vmatpush3.bf16.msra.mxu1 %v442_v4  ;;  %v447_v9 = vld [vmem:[%s637_s3 + $0x10] sm:$0xff]   ;;  %v448_v10 = vld [vmem:[%s637_s3 + $0x8] sm:$0xff]   ;;  %v449_v11 = vld [vmem:[%s637_s3] sm:$0xff]  }
  0x20   :  { %415 = vmatprep.subr.bf16.mxu0 %v506_v0  ;;  %397 = vmatprep.subr.bf16.mxu1 %v506_v0  ;;  %v450_v12 = vld [vmem:[%s639_s5 + $0x38] sm:$0xff]   ;;  %v451_v13 = vld [vmem:[%s639_s5 + $0x30] sm:$0xff]   ;;  %v452_v14 = vld [vmem:[%s639_s5 + $0x28] sm:$0xff]  }
  0x21   :  { %v453_v15 = vld [vmem:[%s639_s5 + $0x20] sm:$0xff]   ;;  %v454_v16 = vld [vmem:[%s639_s5 + $0x18] sm:$0xff]   ;;  %v455_v17 = vld [vmem:[%s639_s5 + $0x10] sm:$0xff]  }
  0x22   :  { %392 = vmatmul.mubr.msk.bf16.vlgmr.msra.gmra.mxu0 %vm70_vm1, %v54_v3  ;;  %v348_v18 = vld [vmem:[%s636_s2] ss:$0 sm:$0xff]  ;;  %v456_v26 = vld [vmem:[%s639_s5 + $0x8] sm:$0xff]  }
  0x23   :  { %431 = vmatprep.mubr.msk.bf16.mxu0 %vm507_vm0, %v506_v0  ;;  %398 = vmatpush3.bf16.msra.mxu1 %v443_v5  ;;  %v457_v27 = vld [vmem:[%s639_s5] sm:$0xff]   ;;  %v351_v28 = vld [vmem:[#allocation4] ss:$0 sm:$0xff] }
  0x24   :  { %399 = vmatprep.subr.bf16.mxu1 %v506_v0  ;;  %416 = vmatpush3.bf16.msra.mxu0 %v450_v12  ;;  %v360_v36 = vld [vmem:[%s640_s6] ss:$0 sm:$0xff] }
  0x25   :  { %417 = vmatprep.subr.bf16.mxu0 %v506_v0 }
  0x27   :  { %400 = vmatpush3.bf16.msra.mxu1 %v444_v6 }
  0x28   :  { %401 = vmatprep.subr.bf16.mxu1 %v506_v0  ;;  %418 = vmatpush3.bf16.msra.mxu0 %v451_v13 }
  0x29   :  { %419 = vmatprep.subr.bf16.mxu0 %v506_v0 }
  0x2b   :  { %402 = vmatpush3.bf16.msra.mxu1 %v445_v7 }
  0x2c   :  { %403 = vmatprep.subr.bf16.mxu1 %v506_v0  ;;  %420 = vmatpush3.bf16.msra.mxu0 %v452_v14 }
  0x2d   :  { %421 = vmatprep.subr.bf16.mxu0 %v506_v0 }
  0x2f   :  { %404 = vmatpush3.bf16.msra.mxu1 %v446_v8 }
  0x30   :  { %405 = vmatprep.subr.bf16.mxu1 %v506_v0  ;;  %422 = vmatpush3.bf16.msra.mxu0 %v453_v15 }
  0x31   :  { %423 = vmatprep.subr.bf16.mxu0 %v506_v0 }
  0x33   :  { %406 = vmatpush3.bf16.msra.mxu1 %v447_v9 }
  0x34   :  { %407 = vmatprep.subr.bf16.mxu1 %v506_v0  ;;  %424 = vmatpush3.bf16.msra.mxu0 %v454_v16 }
  0x35   :  { %425 = vmatprep.subr.bf16.mxu0 %v506_v0 }
  0x37   :  { %408 = vmatpush3.bf16.msra.mxu1 %v448_v10 }
  0x38   :  { %409 = vmatprep.subr.bf16.mxu1 %v506_v0  ;;  %426 = vmatpush3.bf16.msra.mxu0 %v455_v17 }
  0x39   :  { %427 = vmatprep.subr.bf16.mxu0 %v506_v0 }
  0x3b   :  { %410 = vmatpush3.bf16.msra.mxu1 %v449_v11 }
  0x3c   :  { %428 = vmatpush3.bf16.msra.mxu0 %v456_v26 }
  0x3d   :  { %429 = vmatprep.subr.bf16.mxu0 %v506_v0 }
  0x40   :  { %430 = vmatpush3.bf16.msra.mxu0 %v457_v27 }
  0xe2   :  { %v108_v19 = vpop.f32.mrf.mxu0 }
  0xe3   :  { %v109_v20 = vadd.f32 %v348_v18, %v108_v19 }
  0xe4   :  { %v393_v21 = vpop.f32.mrf.mxu0 }
  0xe5   :  { %v114_v22 = vmax.f32 %v109_v20, 0.0 }
  0xe6   :  { %v111_v23 = vpop.f32.mrf.mxu0 }
  0xe7   :  { %v115_v24 = vpack.c.bf16 %v114_v22, %v114_v22 }
  0xe8   :  { %v394_v25 = vpop.f32.mrf.mxu0 }
  0xe9   :  { %412 = vmatmul.mubr.bf16.vlgmr.msra.gmra.mxu1 %v115_v24 }
 0x1a9   :  { %v221_v29 = vpop.f32.mrf.mxu1 }
 0x1aa   :  { %v222_v30 = vadd.f32 %v351_v28, %v221_v29 }
 0x1ab   :  { %v413_v31 = vpop.f32.mrf.mxu1 }
 0x1ac   :  { %v227_v32 = vmax.f32 %v222_v30, 0.0 }
 0x1ad   :  { %v224_v33 = vpop.f32.mrf.mxu1 }
 0x1ae   :  { %v228_v34 = vpack.c.bf16 %v227_v32, %v227_v32 }
 0x1af   :  { %v414_v35 = vpop.f32.mrf.mxu1 }
 0x1b0   :  { %432 = vmatmul.mubr.bf16.vlgmr.msra.gmra.mxu0 %v228_v34 }
 0x270   :  { %v334_v37 = vpop.f32.mrf.mxu0 }
 0x271   :  { %v335_v38 = vadd.f32 %v360_v36, %v334_v37 }
 0x272   :  { %v433_v39 = vpop.f32.mrf.mxu0 }
 0x273   :  { %341 = vst.msk [vmem:[%s641_s7] sm:$0xff] %vm340_vm2, %v335_v38 }
 0x274   :  { %v337_v40 = vpop.f32.mrf.mxu0 }
 0x276   :  { %v434_v41 = vpop.f32.mrf.mxu0 }
 0x277   :  { %346 = vsyncpa [#allocation3], 1 }
 0x278   :  { %347 = vsyncpa [#allocation5], 1 }

</bundles_post_ra>
